<compile_context>
chip_gen: v6e
topology: v6e:2x2x1
jax: 0.10.0
libtpu: 0.0.40
codegen_flags: <defaults>
</compile_context>

<pallas_src>
import functools

import jax
import jax.numpy as jnp
from jax.experimental import pallas as pl
from jax.experimental.pallas import tpu as pltpu


def _attention_kernel(x_ref, wqkv_ref, wout_ref, bout_ref, o_ref,
                      *, heads, dim_head, compute_dtype):
    # x_ref:    (Bb, N, DIM)       activations for this batch tile
    # wqkv_ref: (DIM, 3*inner)     to_qkv.weight^T, Q columns pre-scaled by 1/sqrt(d)
    # wout_ref: (inner, DIM)       to_out.weight^T (single tile)
    # bout_ref: (1, DIM)           to_out.bias
    # o_ref:    (Bb, N, DIM)       natural output layout
    Bb, N, DIM = x_ref.shape
    inner = heads * dim_head

    # Fused QKV projection: one MXU push over all Bb*N tokens.
    x2 = x_ref[...].reshape(Bb * N, DIM).astype(compute_dtype)
    qkv = jnp.dot(x2, wqkv_ref[...].astype(compute_dtype),
                  preferred_element_type=jnp.float32)            # (Bb*N, 3*inner) f32

    # (Bb*N, inner) -> (Bb*heads, N, dim_head): one relayout per tensor, so the
    # attention below is a single batched einsum pair (single batch dim, which
    # Mosaic lowers) instead of an unrolled per-head loop.
    def split_heads(t):
        return (t.reshape(Bb, N, heads, dim_head)
                 .transpose(0, 2, 1, 3)
                 .reshape(Bb * heads, N, dim_head))

    q = split_heads(qkv[:, :inner])              # attention scale pre-folded into W_q
    k = split_heads(qkv[:, inner:2 * inner])
    v = split_heads(qkv[:, 2 * inner:])

    dots = jnp.einsum("bid,bjd->bij",
                      q.astype(compute_dtype), k.astype(compute_dtype),
                      preferred_element_type=jnp.float32)        # (Bb*heads, N, N)

    # Softmax kept strictly in f32 (v5e has no bf16 VPU/EUP).
    m = jnp.max(dots, axis=-1, keepdims=True)
    e = jnp.exp(dots - m)
    attn = e * pl.reciprocal(jnp.sum(e, axis=-1, keepdims=True), approx=True)

    out = jnp.einsum("bij,bjd->bid",
                     attn.astype(compute_dtype), v.astype(compute_dtype),
                     preferred_element_type=jnp.float32)         # (Bb*heads, N, d)

    # (Bb*heads, N, d) -> (Bb*N, inner), then ONE output-projection matmul with
    # the bias fused into the epilogue (single broadcast + add).
    out = (out.reshape(Bb, heads, N, dim_head)
              .transpose(0, 2, 1, 3)
              .reshape(Bb * N, inner))
    proj = jnp.dot(out.astype(compute_dtype), wout_ref[...].astype(compute_dtype),
                   preferred_element_type=jnp.float32) + bout_ref[...]
    o_ref[...] = proj.reshape(Bb, N, DIM).astype(o_ref.dtype)


def _default_batch_tiles(batch, seq):
    """v7x has 2 TensorCores per chip.  Splitting the batch across them only
    pays off once each core gets at least a few thousand tokens; below that the
    duplicated weight DMAs and ~0.35us per-grid-step overhead are a net loss.
    v5e/v6e have a single TC, so the grid is always collapsed to one step."""
    if batch % 2 != 0:
        return 1
    try:
        kind = jax.devices()[0].device_kind.lower()
    except Exception:
        kind = ""
    if "v7" in kind and batch * seq >= 4096:
        return 2
    return 1


def prepare_attention_params(w_qkv, w_out, b_out, *, heads, dim_head):
    """One-time parameter prep (cache the result; do NOT redo per forward):
    transpose the PyTorch Linear weights to row-major `x @ W` layout and fold
    the 1/sqrt(dim_head) attention scale into the Q columns of the QKV weight."""
    inner = heads * dim_head
    scale = dim_head ** (-0.5)
    wqkv_t = jnp.asarray(w_qkv, jnp.float32).T                   # (DIM, 3*inner)
    wqkv_t = wqkv_t.at[:, :inner].multiply(scale)                # fold scale into Q
    wout_t = jnp.asarray(w_out, jnp.float32).T                   # (inner, DIM)
    dim = wout_t.shape[1]
    bout2d = jnp.asarray(b_out, jnp.float32).reshape(1, dim)
    return wqkv_t, wout_t, bout2d


@functools.lru_cache(maxsize=None)
def _build_call(B, N, DIM, heads, dim_head, batch_tiles, compute_dtype):
    inner = heads * dim_head
    Bb = B // batch_tiles
    kernel = functools.partial(_attention_kernel, heads=heads,
                               dim_head=dim_head, compute_dtype=compute_dtype)

    def weight_spec(shape):
        idx = lambda t: (0, 0)
        if batch_tiles > 1:
            # Grid-invariant weights: single buffer, no re-prefetch per step.
            return pl.BlockSpec(shape, idx, pipeline_mode=pl.Buffered(1))
        return pl.BlockSpec(shape, idx)

    return pl.pallas_call(
        kernel,
        out_shape=jax.ShapeDtypeStruct((B, N, DIM), jnp.float32),
        grid_spec=pltpu.PrefetchScalarGridSpec(
            num_scalar_prefetch=0,
            grid=(batch_tiles,),
            in_specs=[
                pl.BlockSpec((Bb, N, DIM), lambda t: (t, 0, 0)),
                weight_spec((DIM, 3 * inner)),
                weight_spec((inner, DIM)),
                weight_spec((1, DIM)),
            ],
            out_specs=pl.BlockSpec((Bb, N, DIM), lambda t: (t, 0, 0)),
        ),
        compiler_params=pltpu.CompilerParams(
            dimension_semantics=("parallel",)),
    )


def attention_forward(x, params, *, heads, dim_head, batch_tiles=None,
                      compute_dtype=jnp.float32):
    """x: (B, N, DIM).  params: output of prepare_attention_params.

    compute_dtype controls the MXU matmul operand dtype: jnp.bfloat16 halves
    vreg/VMEM traffic on v6e/v7x (softmax stays f32 regardless); keep the f32
    default when bit-closeness to an f32 reference matters or on v5e.
    """
    wqkv_t, wout_t, bout2d = params
    B, N, DIM = x.shape
    if batch_tiles is None:
        batch_tiles = _default_batch_tiles(B, N)
    if B % batch_tiles != 0:
        batch_tiles = 1
    fn = _build_call(B, N, DIM, heads, dim_head, batch_tiles,
                     jnp.dtype(compute_dtype))
    return fn(x.astype(jnp.float32), wqkv_t, wout_t, bout2d)
    # TODO(synk): for N >~ 1-2K add a kv grid axis with an online-softmax
    # accumulator (flash-style) so the (B*heads, N, N) buffer never has to fit
    # VMEM (matters first on v7x's 64 MiB VMEM).


def attention_reference(x, w_qkv, w_out, b_out, *, heads, dim_head):
    """Pure-JAX reference mirroring the PyTorch forward."""
    B, N, DIM = x.shape
    inner = heads * dim_head
    scale = dim_head ** (-0.5)
    qkv = jnp.einsum("bnc,oc->bno", x, w_qkv)          # Linear, no bias
    q, k, v = jnp.split(qkv, 3, axis=-1)

    def to_heads(t):
        return t.reshape(B, N, heads, dim_head).transpose(0, 2, 1, 3)

    q, k, v = map(to_heads, (q, k, v))
    dots = jnp.einsum("bhid,bhjd->bhij", q, k) * scale
    attn = jax.nn.softmax(dots, axis=-1)
    out = jnp.einsum("bhij,bhjd->bhid", attn, v)
    out = out.transpose(0, 2, 1, 3).reshape(B, N, inner)
    return jnp.einsum("bni,oi->bno", out, w_out) + b_out


if __name__ == "__main__":
    # Module config (small, consistent with the forward pass):
    DIM = 32          # model dim
    HEADS = 4         # num_heads
    DIM_HEAD = 8      # dim_head  -> inner_dim = 32, project_out = True
    B, N = 2, 8       # batch, sequence length

    key = jax.random.PRNGKey(0)
    k_x, k_qkv, k_out, k_b = jax.random.split(key, 4)

    x = jax.random.normal(k_x, (B, N, DIM), dtype=jnp.float32)
    # Deterministic synthetic parameters (PyTorch Linear layout: (out, in)).
    w_qkv = 0.05 * jax.random.normal(k_qkv, (3 * HEADS * DIM_HEAD, DIM), jnp.float32)
    w_out = 0.05 * jax.random.normal(k_out, (DIM, HEADS * DIM_HEAD), jnp.float32)
    b_out = 0.01 * jax.random.normal(k_b, (DIM,), jnp.float32)

    # One-time weight prep (transpose / scale fold).
    params = prepare_attention_params(w_qkv, w_out, b_out,
                                      heads=HEADS, dim_head=DIM_HEAD)

    # jit the wrapper so the (lru_cached) pallas_call is traced exactly once.
    fwd = jax.jit(functools.partial(attention_forward,
                                    heads=HEADS, dim_head=DIM_HEAD))
    out = jax.block_until_ready(fwd(x, params))

    ref = attention_reference(x, w_qkv, w_out, b_out,
                              heads=HEADS, dim_head=DIM_HEAD)
    assert out.shape == (B, N, DIM)
    # Tolerance covers the approximate (EUP) reciprocal used for the softmax
    # normalization (~1e-4 relative vs. an exact softmax).
    assert jnp.allclose(out, ref, atol=1e-3, rtol=1e-3), "mismatch vs reference"

    print("KERNEL_OK")
</pallas_src>

<mosaic_0001>
module attributes {stable_mosaic.version = 11 : i64} {
  func.func @_attention_kernel(%arg0: i32, %arg1: memref<2x8x32xf32, #tpu.memory_space<vmem>>, %arg2: memref<32x96xf32, #tpu.memory_space<vmem>>, %arg3: memref<32x32xf32, #tpu.memory_space<vmem>>, %arg4: memref<1x32xf32, #tpu.memory_space<vmem>>, %arg5: memref<2x8x32xf32, #tpu.memory_space<vmem>>) attributes {dimension_semantics = [#tpu.dimension_semantics<parallel>], iteration_bounds = array<i64: 1>, scalar_prefetch = 0 : i64, scratch_operands = 0 : i64, tpu.core_type = #tpu.core_type<tc>, window_params = [{transform_indices = @transform_0, window_bounds = array<i64: 2, 8, 32>}, {pipeline_mode = #tpu.pipeline_mode<synchronous>, transform_indices = @transform_1, window_bounds = array<i64: 32, 96>}, {pipeline_mode = #tpu.pipeline_mode<synchronous>, transform_indices = @transform_2, window_bounds = array<i64: 32, 32>}, {pipeline_mode = #tpu.pipeline_mode<synchronous>, transform_indices = @transform_3, window_bounds = array<i64: 1, 32>}, {transform_indices = @transform_4, window_bounds = array<i64: 2, 8, 32>}]} {
    %c0 = arith.constant 0 : index
    %c0_0 = arith.constant 0 : index
    %c0_1 = arith.constant 0 : index
    %0 = vector.load %arg1[%c0, %c0_0, %c0_1] : memref<2x8x32xf32, #tpu.memory_space<vmem>>, vector<2x8x32xf32>
    %1 = vector.shape_cast %0 : vector<2x8x32xf32> to vector<16x32xf32>
    %c0_2 = arith.constant 0 : index
    %c0_3 = arith.constant 0 : index
    %2 = vector.load %arg2[%c0_2, %c0_3] : memref<32x96xf32, #tpu.memory_space<vmem>>, vector<32x96xf32>
    %cst = arith.constant dense<0.000000e+00> : vector<16x96xf32>
    %3 = tpu.matmul %1, %2, %cst {dimension_numbers = #tpu.dot_dimension_numbers<[1], [0], [0], [1], [0, 0, 1, 1], [], []>} : vector<16x32xf32>, vector<32x96xf32>, vector<16x96xf32> -> vector<16x96xf32>
    %4 = vector.extract_strided_slice %3 {offsets = [0, 0], sizes = [16, 32], strides = [1, 1]} : vector<16x96xf32> to vector<16x32xf32>
    %5 = vector.shape_cast %4 : vector<16x32xf32> to vector<2x8x4x8xf32>
    %6 = tpu.transpose %5, [0, 2, 1, 3] : vector<2x8x4x8xf32> -> vector<2x4x8x8xf32>
    %7 = vector.shape_cast %6 : vector<2x4x8x8xf32> to vector<8x8x8xf32>
    %8 = vector.extract_strided_slice %3 {offsets = [0, 32], sizes = [16, 32], strides = [1, 1]} : vector<16x96xf32> to vector<16x32xf32>
    %9 = vector.shape_cast %8 : vector<16x32xf32> to vector<2x8x4x8xf32>
    %10 = tpu.transpose %9, [0, 2, 1, 3] : vector<2x8x4x8xf32> -> vector<2x4x8x8xf32>
    %11 = vector.shape_cast %10 : vector<2x4x8x8xf32> to vector<8x8x8xf32>
    %12 = vector.extract_strided_slice %3 {offsets = [0, 64], sizes = [16, 32], strides = [1, 1]} : vector<16x96xf32> to vector<16x32xf32>
    %13 = vector.shape_cast %12 : vector<16x32xf32> to vector<2x8x4x8xf32>
    %14 = tpu.transpose %13, [0, 2, 1, 3] : vector<2x8x4x8xf32> -> vector<2x4x8x8xf32>
    %15 = vector.shape_cast %14 : vector<2x4x8x8xf32> to vector<8x8x8xf32>
    "tpu.trace_start"() <{level = 10 : i32, message = "bid,bjd->bij"}> : () -> ()
    %cst_4 = arith.constant dense<0.000000e+00> : vector<8x8x8xf32>
    %16 = tpu.matmul %7, %11, %cst_4 {dimension_numbers = #tpu.dot_dimension_numbers<[2], [2], [1], [1], [0, 0, 0, 1, 1, 1], [0], [0]>} : vector<8x8x8xf32>, vector<8x8x8xf32>, vector<8x8x8xf32> -> vector<8x8x8xf32>
    "tpu.trace_stop"() : () -> ()
    %cst_5 = arith.constant dense<0xFF800000> : vector<8x8xf32>
    %17 = vector.multi_reduction <maximumf>, %16, %cst_5 [2] : vector<8x8x8xf32> to vector<8x8xf32>
    %18 = vector.shape_cast %17 : vector<8x8xf32> to vector<8x8x1xf32>
    %19 = vector.broadcast %18 : vector<8x8x1xf32> to vector<8x8x8xf32>
    %20 = arith.subf %16, %19 : vector<8x8x8xf32>
    %21 = math.exp %20 : vector<8x8x8xf32>
    %cst_6 = arith.constant dense<0.000000e+00> : vector<8x8xf32>
    %22 = vector.multi_reduction <add>, %21, %cst_6 [2] : vector<8x8x8xf32> to vector<8x8xf32>
    %23 = vector.shape_cast %22 : vector<8x8xf32> to vector<8x8x1xf32>
    %24 = tpu.reciprocal %23 {approx = true} : vector<8x8x1xf32> -> vector<8x8x1xf32>
    %25 = vector.broadcast %24 : vector<8x8x1xf32> to vector<8x8x8xf32>
    %26 = arith.mulf %21, %25 : vector<8x8x8xf32>
    "tpu.trace_start"() <{level = 10 : i32, message = "bij,bjd->bid"}> : () -> ()
    %cst_7 = arith.constant dense<0.000000e+00> : vector<8x8x8xf32>
    %27 = tpu.matmul %26, %15, %cst_7 {dimension_numbers = #tpu.dot_dimension_numbers<[2], [1], [1], [2], [0, 0, 0, 1, 1, 2], [0], [0]>} : vector<8x8x8xf32>, vector<8x8x8xf32>, vector<8x8x8xf32> -> vector<8x8x8xf32>
    "tpu.trace_stop"() : () -> ()
    %28 = vector.shape_cast %27 : vector<8x8x8xf32> to vector<2x4x8x8xf32>
    %29 = tpu.transpose %28, [0, 2, 1, 3] : vector<2x4x8x8xf32> -> vector<2x8x4x8xf32>
    %30 = vector.shape_cast %29 : vector<2x8x4x8xf32> to vector<16x32xf32>
    %c0_8 = arith.constant 0 : index
    %c0_9 = arith.constant 0 : index
    %31 = vector.load %arg3[%c0_8, %c0_9] : memref<32x32xf32, #tpu.memory_space<vmem>>, vector<32x32xf32>
    %cst_10 = arith.constant dense<0.000000e+00> : vector<16x32xf32>
    %32 = tpu.matmul %30, %31, %cst_10 {dimension_numbers = #tpu.dot_dimension_numbers<[1], [0], [0], [1], [0, 0, 1, 1], [], []>} : vector<16x32xf32>, vector<32x32xf32>, vector<16x32xf32> -> vector<16x32xf32>
    %c0_11 = arith.constant 0 : index
    %c0_12 = arith.constant 0 : index
    %33 = vector.load %arg4[%c0_11, %c0_12] : memref<1x32xf32, #tpu.memory_space<vmem>>, vector<1x32xf32>
    %34 = vector.broadcast %33 : vector<1x32xf32> to vector<16x32xf32>
    %35 = arith.addf %32, %34 : vector<16x32xf32>
    %36 = vector.shape_cast %35 : vector<16x32xf32> to vector<2x8x32xf32>
    %c0_13 = arith.constant 0 : index
    %c0_14 = arith.constant 0 : index
    %c0_15 = arith.constant 0 : index
    %37 = vector.load %arg5[%c0_13, %c0_14, %c0_15] : memref<2x8x32xf32, #tpu.memory_space<vmem>>, vector<2x8x32xf32>
    tpu.vector_store %arg5[%c0_13, %c0_14, %c0_15], %36 {strides = array<i32>} : memref<2x8x32xf32, #tpu.memory_space<vmem>>, vector<2x8x32xf32>,
    return
  }
  func.func @transform_0(%arg0: i32) -> (i32, i32, i32) {
    %c0_i32 = arith.constant 0 : i32
    %c0_i32_0 = arith.constant 0 : i32
    %c0_i32_1 = arith.constant 0 : i32
    return %arg0, %c0_i32, %c0_i32_0 : i32, i32, i32
  }
  func.func @transform_1(%arg0: i32) -> (i32, i32) {
    %c0_i32 = arith.constant 0 : i32
    %c0_i32_0 = arith.constant 0 : i32
    %c0_i32_1 = arith.constant 0 : i32
    return %c0_i32, %c0_i32_0 : i32, i32
  }
  func.func @transform_2(%arg0: i32) -> (i32, i32) {
    %c0_i32 = arith.constant 0 : i32
    %c0_i32_0 = arith.constant 0 : i32
    %c0_i32_1 = arith.constant 0 : i32
    return %c0_i32, %c0_i32_0 : i32, i32
  }
  func.func @transform_3(%arg0: i32) -> (i32, i32) {
    %c0_i32 = arith.constant 0 : i32
    %c0_i32_0 = arith.constant 0 : i32
    %c0_i32_1 = arith.constant 0 : i32
    return %c0_i32, %c0_i32_0 : i32, i32
  }
  func.func @transform_4(%arg0: i32) -> (i32, i32, i32) {
    %c0_i32 = arith.constant 0 : i32
    %c0_i32_0 = arith.constant 0 : i32
    %c0_i32_1 = arith.constant 0 : i32
    return %arg0, %c0_i32, %c0_i32_0 : i32, i32, i32
  }
}

</mosaic_0001>

<bundles_post_ra>
// kernel: attention_forward.1
= control target key start
LH: loop header
LB: loop body
LE: loop exit
PB: predicated region body
PF: predicated region fallthrough
CT: control target
= control target key end

     0   :  { %9 = vsyncpa [#allocation3], 0  ;;  %s3476_s0 = inlined_call_operand.hbm [shape: f32[2,8,32], index: 0, kind: input, shape index: {}]   ;;  %s3477_s1 = inlined_call_operand.hbm [shape: f32[32,96], index: 1, kind: input, shape index: {}]   ;;  %s3478_s2 = inlined_call_operand.hbm [shape: f32[32,32], index: 2, kind: input, shape index: {}]   ;;  %s3479_s3 = inlined_call_operand.vmem [shape: f32[1,32], index: 3, kind: input, shape index: {}]   ;;  %s3480_s4 = inlined_call_operand.hbm [shape: f32[2,8,32], index: 4, kind: output, shape index: {}]  }
   0x1   :  { %10 = vsyncpa [#allocation6], 0 }
   0x2   :  { %11 = vsyncpa [#allocation4], 0  ;;  %s3054_s15 = smov [#allocation5]   ;;  %s3055_s17 = smov [#allocation2]  }
   0x3   :  { %s29_s16 = sshll.u32 %s3054_s15, 4  ;;  %s17_s18 = sshll.u32 %s3055_s17, 4  ;;  %s30_s16 = int_to_ptr.vmem [resolvable:$true] %s29_s16  ;;  %s18_s18 = int_to_ptr.vmem [resolvable:$true] %s17_s18 }
   0x4   :  { %s2976_s19 = scalar_lea.vmem %s30_s16, 512  ;;  %p2981_p1 = scmp.lt.s32.totalorder %s30_s16, %s30_s16 }
   0x5   :  { %p2977_p0 = scmp.ne.s32.totalorder %s30_s16, %s2976_s19  ;;  %p2982_p2 = scmp.lt.s32.totalorder %s2976_s19, %s2976_s19 }
   0x7   :  { %p2983_p3 = por %p2982_p2, %p2981_p1 }
   0x9   :  { %p2984_p4 = pnand %p2983_p3, %p2977_p0 }
   0xb   :  { %2987 = shalt.err (!%p2984_p4)
}
   0xc   :  { %s3056_s20 = smov 128   ;;  %s3057_s21 = smov 8  }
   0xd   :  { %35 = dma.hbm_to_vmem [thread:$0]  %s3477_s1, 512, %s30_s16, [#allocation6], %s3056_s20, %s3056_s20, %s3057_s21  }
   0xe   :  { %s2996_s24 = scalar_lea.vmem %s18_s18, 256  ;;  %p3001_p6 = scmp.lt.s32.totalorder %s18_s18, %s18_s18 }
   0xf   :  { %p2997_p5 = scmp.ne.s32.totalorder %s18_s18, %s2996_s24  ;;  %p3002_p7 = scmp.lt.s32.totalorder %s2996_s24, %s2996_s24 }
  0x11   :  { %p3003_p8 = por %p3002_p7, %p3001_p6 }
  0x13   :  { %p3004_p9 = pnand %p3003_p8, %p2997_p5 }
  0x15   :  { %3007 = shalt.err (!%p3004_p9)
}
  0x16   :  { %23 = dma.hbm_to_vmem [thread:$0]  %s3476_s0, 256, %s18_s18, [#allocation3], %s3056_s20, %s3056_s20, %s3057_s21  }
  0x17   :  { %s3058_s27 = smov [#allocation7]  }
  0x18   :  { %s41_s28 = sshll.u32 %s3058_s27, 4  ;;  %s42_s28 = int_to_ptr.vmem [resolvable:$true] %s41_s28 }
  0x19   :  { %s3016_s29 = scalar_lea.vmem %s42_s28, 512  ;;  %p3021_p11 = scmp.lt.s32.totalorder %s42_s28, %s42_s28 }
  0x1a   :  { %p3017_p10 = scmp.ne.s32.totalorder %s42_s28, %s3016_s29  ;;  %p3022_p12 = scmp.lt.s32.totalorder %s3016_s29, %s3016_s29 }
  0x1c   :  { %p3023_p13 = por %p3022_p12, %p3021_p11 }
  0x1e   :  { %p3024_p0 = pnand %p3023_p13, %p3017_p10 }
  0x20   :  { %3027 = shalt.err (!%p3024_p0)
}
  0x21   :  { %47 = dma.hbm_to_vmem [thread:$0]  %s3478_s2, 512, %s42_s28, [#allocation6], %s3056_s20, %s3056_s20, %s3057_s21  }
  0x22   :  { %3048 = dma.done.wait [#allocation3], 256  }
  0x23   :  { %3049 = vsyncadd [#allocation3], 4294967040 }
  0x24   :  { %3050 = dma.done.wait [#allocation6], 1024  }
  0x25   :  { %3051 = vsyncadd [#allocation6], 4294966272  ;;  %vm65_vm0 = vcmask 261120   ;;  %v64_v0 = vld [vmem:[#allocation5 + $0x18] sm:$0xff]  ;;  %v63_v1 = vld [vmem:[#allocation5 + $0x10] sm:$0xff]  ;;  %s3059_s0 = smov 104   ;;  %v172_v17 = vlaneseq }
  0x26   :  { %2817 = vmatprep.subr.mxu0 %v64_v0  ;;  %v59_v2 = vld [vmem:[#allocation2] sm:$0xff]  ;;  %v62_v3 = vld [vmem:[#allocation5 + $0x8] sm:$0xff]  ;;  %v61_v4 = vld [vmem:[#allocation5] sm:$0xff]  ;;  %s3060_s2 = smov 120   ;;  %s3061_s5 = smov 112   ;;  %v3063_v14 = vmov 0.0  }
  0x27   :  { %2818 = vmatpush3.msra.mxu0 %v64_v0  ;;  %2825 = vmatprep.mubr.msk.f32.mxu0 %vm65_vm0, %v59_v2  ;;  %v60_v5 = vld [vmem:[#allocation2 + $0x8] sm:$0xff]  ;;  %s3062_s6 = smov 96   ;;  %s3064_s7 = smov 64   ;;  %vm3065_vm1 = vmmov 0   ;;  %v3066_v15 = vmov 1983009808  }
  0x28   :  { %2819 = vmatprep.subr.mxu0 %v63_v1  ;;  %2828 = vmatprep.subr.mxu1 %v3063_v14  ;;  %v170_v16 = vunpack.c.l.s4 %v3066_v15  ;;  %v173_v19 = vshrl.u32 %v172_v17, 7  ;;  %v3067_v20 = vmov 1934713408   ;;  %vm1031_vm2 = vcmask 64512   ;;  %s3068_s8 = smov 16   ;;  %s3069_s9 = smov 24  }
  0x29   :  { %2820 = vmatpush3.msra.mxu0 %v63_v1  ;;  %2830 = vmatprep.mubr.msk.f32.mxu1 %vm3065_vm1, %v3063_v14  ;;  %v202_v21 = vunpack.c.l.s4 %v3067_v20  ;;  %vm2610_vm3 = vcmask 130048   ;;  %vm2613_vm4 = vcmask 195584   ;;  %s3070_s12 = smov [#allocation8]  }
  0x2a   :  { %2821 = vmatprep.subr.mxu0 %v62_v3  ;;  %v171_v18 = vunpack.c.0.s8 %v170_v16  ;;  %s2715_s13 = sshll.u32 %s3070_s12, 4  ;;  %s2716_s13 = int_to_ptr.vmem [resolvable:$true] %s2715_s13 }
  0x2b   :  { %2822 = vmatpush3.msra.mxu0 %v62_v3  ;;  %v203_v27 = vunpack.c.0.s8 %v202_v21  ;;  %s3028_s14 = scalar_lea.vmem %s2716_s13, 256  ;;  %p3033_p2 = scmp.lt.s32.totalorder %s2716_s13, %s2716_s13 }
  0x2c   :  { %2823 = vmatprep.subr.mxu0 %v61_v4  ;;  %v3146_v23 = vsub.s32 %v171_v18, %v173_v19  ;;  %p3029_p1 = scmp.ne.s32.totalorder %s2716_s13, %s3028_s14  ;;  %p3034_p3 = scmp.lt.s32.totalorder %s3028_s14, %s3028_s14 }
  0x2d   :  { %2824 = vmatpush3.msra.mxu0 %v61_v4  ;;  %v3159_v34 = vsub.s32 %v203_v27, %v173_v19 }
  0x2e   :  { %2826 = vmatmul.mubr.msk.f32.vlgmr.msra.gmra.mxu0 %vm65_vm0, %v60_v5  ;;  %2848 = vmatprep.subr.mxu0 %v3063_v14  ;;  %p3035_p4 = por %p3034_p3, %p3033_p2 }
  0x2f   :  { %2850 = vmatprep.mubr.msk.f32.mxu0 %vm3065_vm1, %v3063_v14 }
  0x30   :  { %p3036_p5 = pnand %p3035_p4, %p3029_p1 }
  0xee   :  { %v3116_v6 = vpop.f32.mrf.mxu0 }
  0xf0   :  { %v138_v7 = vpop.f32.mrf.mxu0 }
  0xf1   :  { %161 = vrot.lane.b32.xlu1 %v138_v7, %s3059_s0  ;;  %149 = vrot.lane.b32.xlu0 %v138_v7, %s3060_s2 }
  0xf5   :  { %151 = vrot.lane.b32.xlu1 %v3116_v6, %s3060_s2  ;;  %155 = vrot.lane.b32.xlu0 %v138_v7, %s3061_s5 }
  0xf9   :  { %163 = vrot.lane.b32.xlu1 %v3116_v6, %s3059_s0  ;;  %157 = vrot.lane.b32.xlu0 %v3116_v6, %s3061_s5 }
  0xfd   :  { %439 = vrot.lane.b32.xlu0 %v138_v7, %s3062_s6 }
 0x163   :  { %v3121_v8 = vpop.permute.xlu1 %161  ;;  %v150_v9 = vpop.permute.xlu0 %149 }
 0x164   :  { %443 = vrot.lane.b32.xlu1 %v150_v9, %s3062_s6  ;;  %v183_v24 = vcombine.low %v150_v9, %v3121_v8  ;;  %v184_v26 = vcombine.high %v150_v9, %v3121_v8 }
 0x166   :  { %v191_v29 = vrot.slane %v183_v24, %v3146_v23  ;;  %v198_v33 = vrot.slane %v184_v26, %v3146_v23 }
 0x167   :  { %v3123_v10 = vpop.permute.xlu0 %155  ;;  %v3127_v11 = vpop.permute.xlu1 %151 }
 0x168   :  { %451 = vrot.lane.b32.xlu1 %v3121_v8, %s3062_s6  ;;  %447 = vrot.lane.b32.xlu0 %v3123_v10, %s3062_s6  ;;  %v167_v22 = vcombine.low %v138_v7, %v3123_v10  ;;  %v168_v25 = vcombine.high %v138_v7, %v3123_v10 }
 0x16a   :  { %v175_v28 = vrot.slane %v167_v22, %v3146_v23  ;;  %v182_v30 = vrot.slane %v168_v25, %v3146_v23 }
 0x16b   :  { %v3131_v12 = vpop.permute.xlu1 %163  ;;  %v3133_v13 = vpop.permute.xlu0 %157 }
 0x16c   :  { %445 = vrot.lane.b32.xlu1 %v3127_v11, %s3062_s6  ;;  %441 = vrot.lane.b32.xlu0 %v3116_v6, %s3062_s6  ;;  %v251_v31 = vcombine.low %v3127_v11, %v3131_v12  ;;  %v235_v32 = vcombine.low %v3116_v6, %v3133_v13  ;;  %v199_v35 = vcombine.low %v175_v28, %v191_v29 }
 0x16d   :  { %v200_v36 = vcombine.high %v175_v28, %v191_v29  ;;  %v252_v37 = vcombine.high %v3127_v11, %v3131_v12  ;;  %v236_v38 = vcombine.high %v3116_v6, %v3133_v13  ;;  %v215_v39 = vcombine.low %v182_v30, %v198_v33 }
 0x16e   :  { %v216_v40 = vcombine.high %v182_v30, %v198_v33  ;;  %v259_v41 = vrot.slane %v251_v31, %v3146_v23  ;;  %v243_v42 = vrot.slane %v235_v32, %v3146_v23  ;;  %v207_v43 = vrot.slane %v199_v35, %v3159_v34 }
 0x16f   :  { %v214_v44 = vrot.slane %v200_v36, %v3159_v34  ;;  %v266_v45 = vrot.slane %v252_v37, %v3146_v23  ;;  %v250_v46 = vrot.slane %v236_v38, %v3146_v23  ;;  %v223_v47 = vrot.slane %v215_v39, %v3159_v34  ;;  %v440_v51 = vpop.permute.xlu0 %439 }
 0x170   :  { %453 = vrot.lane.b32.xlu1 %v3131_v12, %s3062_s6  ;;  %449 = vrot.lane.b32.xlu0 %v3133_v13, %s3062_s6  ;;  %v230_v48 = vrot.slane %v216_v40, %v3159_v34  ;;  %v267_v49 = vcombine.low %v243_v42, %v259_v41  ;;  %v268_v50 = vcombine.high %v243_v42, %v259_v41 }
 0x171   :  { %v303_v53 = vcombine.low %v207_v43, %v214_v44  ;;  %v283_v54 = vcombine.low %v250_v46, %v266_v45  ;;  %v284_v55 = vcombine.high %v250_v46, %v266_v45  ;;  %v2730_v56 = vcombine.high %v207_v43, %v214_v44 }
 0x172   :  { %v319_v57 = vcombine.low %v223_v47, %v230_v48  ;;  %v2731_v58 = vcombine.high %v223_v47, %v230_v48  ;;  %v275_v59 = vrot.slane %v267_v49, %v3159_v34  ;;  %v282_v60 = vrot.slane %v268_v50, %v3159_v34 }
 0x173   :  { %v3176_v3 = vrot.slane %v283_v54, %v3159_v34  ;;  %v298_v4 = vrot.slane %v284_v55, %v3159_v34  ;;  %v3180_v5 = vrot.slane %v303_v53, %v3146_v23  ;;  %v3187_v19 = vrot.slane %v2730_v56, %v3146_v23 }
 0x174   :  { %735 = vrot.lane.b32.xlu1 %v138_v7, %s3064_s7  ;;  %739 = vrot.lane.b32.xlu0 %v150_v9, %s3064_s7  ;;  %v371_v17 = vcombine.low %v275_v59, %v282_v60  ;;  %v3190_v20 = vrot.slane %v319_v57, %v3146_v23  ;;  %v3193_v21 = vrot.slane %v2731_v58, %v3146_v23 }
 0x175   :  { %v2732_v28 = vcombine.high %v275_v59, %v282_v60  ;;  %v387_v29 = vcombine.low %v3176_v3, %v298_v4  ;;  %v2733_v36 = vcombine.high %v3176_v3, %v298_v4  ;;  %v335_v38 = vcombine.low %v3180_v5, %v3187_v19 }
 0x176   :  { %v3201_v35 = vrot.slane %v371_v17, %v3146_v23  ;;  %v351_v39 = vcombine.low %v3190_v20, %v3193_v21 }
 0x177   :  { %v3217_v57 = vrot.slane %v2732_v28, %v3146_v23  ;;  %v3220_v58 = vrot.slane %v387_v29, %v3146_v23  ;;  %v343_v3 = vrot.slane %v335_v38, %v3159_v34  ;;  %v402_v17 = vrot.slane %v2733_v36, %v3146_v23 }
 0x178   :  { %v359_v4 = vrot.slane %v351_v39, %v3159_v34  ;;  %v336_v29 = vcombine.high %v3180_v5, %v3187_v19 }
 0x1d6   :  { %v444_v52 = vpop.permute.xlu1 %443 }
 0x1da   :  { %v452_v61 = vpop.permute.xlu1 %451  ;;  %v448_v62 = vpop.permute.xlu0 %447 }
 0x1db   :  { %v479_v63 = vcombine.low %v444_v52, %v452_v61  ;;  %v480_v0 = vcombine.high %v444_v52, %v452_v61  ;;  %v463_v1 = vcombine.low %v440_v51, %v448_v62  ;;  %v464_v2 = vcombine.high %v440_v51, %v448_v62 }
 0x1dd   :  { %v487_v7 = vrot.slane %v479_v63, %v3146_v23  ;;  %v494_v9 = vrot.slane %v480_v0, %v3146_v23  ;;  %v471_v15 = vrot.slane %v463_v1, %v3146_v23  ;;  %v478_v16 = vrot.slane %v464_v2, %v3146_v23 }
 0x1de   :  { %v446_v18 = vpop.permute.xlu1 %445  ;;  %v442_v27 = vpop.permute.xlu0 %441 }
 0x1df   :  { %v495_v22 = vcombine.low %v471_v15, %v487_v7  ;;  %v496_v24 = vcombine.high %v471_v15, %v487_v7  ;;  %v511_v25 = vcombine.low %v478_v16, %v494_v9  ;;  %v512_v26 = vcombine.high %v478_v16, %v494_v9 }
 0x1e1   :  { %v503_v30 = vrot.slane %v495_v22, %v3159_v34  ;;  %v510_v31 = vrot.slane %v496_v24, %v3159_v34  ;;  %v519_v32 = vrot.slane %v511_v25, %v3159_v34  ;;  %v526_v33 = vrot.slane %v512_v26, %v3159_v34 }
 0x1e2   :  { %v454_v37 = vpop.permute.xlu1 %453  ;;  %v450_v44 = vpop.permute.xlu0 %449 }
 0x1e3   :  { %v599_v40 = vcombine.low %v503_v30, %v510_v31  ;;  %v2734_v41 = vcombine.high %v503_v30, %v510_v31  ;;  %v615_v42 = vcombine.low %v519_v32, %v526_v33  ;;  %v2735_v43 = vcombine.high %v519_v32, %v526_v33 }
 0x1e4   :  { %v547_v45 = vcombine.low %v446_v18, %v454_v37  ;;  %v548_v46 = vcombine.high %v446_v18, %v454_v37  ;;  %v531_v47 = vcombine.low %v442_v27, %v450_v44  ;;  %v532_v48 = vcombine.high %v442_v27, %v450_v44 }
 0x1e5   :  { %v606_v49 = vrot.slane %v599_v40, %v3146_v23  ;;  %v614_v50 = vrot.slane %v2734_v41, %v3146_v23  ;;  %v622_v51 = vrot.slane %v615_v42, %v3146_v23  ;;  %v630_v52 = vrot.slane %v2735_v43, %v3146_v23 }
 0x1e6   :  { %v555_v53 = vrot.slane %v547_v45, %v3146_v23  ;;  %v562_v54 = vrot.slane %v548_v46, %v3146_v23  ;;  %v539_v55 = vrot.slane %v531_v47, %v3146_v23  ;;  %v546_v56 = vrot.slane %v532_v48, %v3146_v23 }
 0x1e7   :  { %v631_v59 = vcombine.low %v606_v49, %v614_v50  ;;  %v647_v60 = vcombine.low %v622_v51, %v630_v52  ;;  %v632_v18 = vcombine.high %v606_v49, %v614_v50  ;;  %v648_v22 = vcombine.high %v622_v51, %v630_v52 }
 0x1e8   :  { %v563_v61 = vcombine.low %v539_v55, %v555_v53  ;;  %v564_v62 = vcombine.high %v539_v55, %v555_v53  ;;  %v579_v63 = vcombine.low %v546_v56, %v562_v54  ;;  %v580_v0 = vcombine.high %v546_v56, %v562_v54 }
 0x1e9   :  { %v639_v1 = vrot.slane %v631_v59, %v3159_v34  ;;  %v655_v2 = vrot.slane %v647_v60, %v3159_v34  ;;  %v352_v30 = vcombine.high %v3190_v20, %v3193_v21  ;;  %v367_v31 = vcombine.low %v343_v3, %v359_v4 }
 0x1ea   :  { %v571_v7 = vrot.slane %v563_v61, %v3159_v34  ;;  %v578_v9 = vrot.slane %v564_v62, %v3159_v34  ;;  %v587_v15 = vrot.slane %v579_v63, %v3159_v34  ;;  %v594_v16 = vrot.slane %v580_v0, %v3159_v34 }
 0x1eb   :  { %v663_v24 = vcombine.low %v639_v1, %v655_v2  ;;  %v403_v32 = vcombine.low %v3201_v35, %v3217_v57  ;;  %v664_v39 = vcombine.high %v639_v1, %v655_v2  ;;  %v646_v5 = vrot.slane %v632_v18, %v3159_v34 }
 0x1ec   :  { %v667_v25 = vcombine.low %v571_v7, %v578_v9  ;;  %v2736_v26 = vcombine.high %v571_v7, %v578_v9  ;;  %v683_v27 = vcombine.low %v587_v15, %v594_v16  ;;  %v2737_v28 = vcombine.high %v587_v15, %v594_v16 }
 0x1ed   :  { %2829 = vmatpush3.xpose.msk.msra.mxu1 %vm1031_vm2, %v663_v24  ;;  %v662_v19 = vrot.slane %v648_v22, %v3159_v34  ;;  %v419_v20 = vcombine.low %v3220_v58, %v402_v17  ;;  %v350_v43 = vrot.slane %v336_v29, %v3159_v34  ;;  %v366_v44 = vrot.slane %v352_v30, %v3159_v34 }
 0x1ee   :  { %v674_v33 = vrot.slane %v667_v25, %v3146_v23  ;;  %v682_v36 = vrot.slane %v2736_v26, %v3146_v23  ;;  %v690_v37 = vrot.slane %v683_v27, %v3146_v23  ;;  %v698_v38 = vrot.slane %v2737_v28, %v3146_v23  ;;  %2833 = vmatprep.subr.mxu1 %v3063_v14 }
 0x1ef   :  { %v368_v45 = vcombine.high %v343_v3, %v359_v4  ;;  %v404_v48 = vcombine.high %v3201_v35, %v3217_v57  ;;  %v665_v49 = vcombine.low %v646_v5, %v662_v19  ;;  %v411_v50 = vrot.slane %v403_v32, %v3159_v34 }
 0x1f0   :  { %v699_v21 = vcombine.low %v674_v33, %v682_v36  ;;  %v700_v40 = vcombine.high %v674_v33, %v682_v36  ;;  %v715_v41 = vcombine.low %v690_v37, %v698_v38  ;;  %v716_v42 = vcombine.high %v690_v37, %v698_v38  ;;  %2831 = vmatmul.mubr.msk.f32.vlgmr.msra.gmra.mxu1 %vm1031_vm2, %v367_v31 }
 0x1f1   :  { %2834 = vmatpush3.xpose.msk.msra.mxu1 %vm1031_vm2, %v664_v39  ;;  %2835 = vmatprep.mubr.msk.f32.mxu1 %vm3065_vm1, %v3063_v14  ;;  %v427_v51 = vrot.slane %v419_v20, %v3159_v34  ;;  %v420_v52 = vcombine.high %v3220_v58, %v402_v17  ;;  %v369_v35 = vcombine.low %v350_v43, %v366_v44 }
 0x1f2   :  { %2838 = vmatprep.subr.mxu1 %v3063_v14  ;;  %v707_v46 = vrot.slane %v699_v21, %v3159_v34  ;;  %v723_v47 = vrot.slane %v715_v41, %v3159_v34  ;;  %v714_v54 = vrot.slane %v700_v40, %v3159_v34  ;;  %v730_v55 = vrot.slane %v716_v42, %v3159_v34  ;;  %v736_v21 = vpop.permute.xlu1 %735 }
 0x1f3   :  { %v435_v56 = vcombine.low %v411_v50, %v427_v51  ;;  %v666_v57 = vcombine.high %v646_v5, %v662_v19  ;;  %v418_v58 = vrot.slane %v404_v48, %v3159_v34  ;;  %v434_v59 = vrot.slane %v420_v52, %v3159_v34  ;;  %v740_v19 = vpop.permute.xlu0 %739 }
 0x1f4   :  { %2836 = vmatmul.mubr.msk.f32.vlgmr.msra.gmra.mxu1 %vm1031_vm2, %v368_v45  ;;  %v731_v53 = vcombine.low %v707_v46, %v723_v47  ;;  %v733_v60 = vcombine.low %v714_v54, %v730_v55  ;;  %v370_v61 = vcombine.high %v350_v43, %v366_v44  ;;  %v732_v63 = vcombine.high %v707_v46, %v723_v47 }
 0x1f5   :  { %2839 = vmatpush3.xpose.msk.msra.mxu1 %vm1031_vm2, %v665_v49  ;;  %2840 = vmatprep.mubr.msk.f32.mxu1 %vm3065_vm1, %v3063_v14  ;;  %v437_v62 = vcombine.low %v418_v58, %v434_v59  ;;  %v436_v0 = vcombine.high %v411_v50, %v427_v51  ;;  %v734_v1 = vcombine.high %v714_v54, %v730_v55 }
 0x1f6   :  { %2849 = vmatpush3.xpose.msk.msra.mxu0 %vm1031_vm2, %v731_v53  ;;  %2843 = vmatprep.subr.mxu1 %v3063_v14  ;;  %v438_v2 = vcombine.high %v418_v58, %v434_v59 }
 0x1f7   :  { %2858 = vmatprep.subr.mxu0 %v3063_v14 }
 0x1f8   :  { %2841 = vmatmul.mubr.msk.f32.vlgmr.msra.gmra.mxu1 %vm1031_vm2, %v369_v35 }
 0x1f9   :  { %2851 = vmatmul.mubr.msk.f32.vlgmr.msra.gmra.mxu0 %vm1031_vm2, %v435_v56  ;;  %2844 = vmatpush3.xpose.msk.msra.mxu1 %vm1031_vm2, %v666_v57 }
 0x1fa   :  { %2859 = vmatpush3.xpose.msk.msra.mxu0 %vm1031_vm2, %v733_v60  ;;  %2845 = vmatprep.mubr.msk.f32.mxu1 %vm3065_vm1, %v3063_v14 }
 0x1fb   :  { %2860 = vmatprep.mubr.msk.f32.mxu0 %vm3065_vm1, %v3063_v14  ;;  %2853 = vmatprep.subr.mxu1 %v3063_v14 }
 0x1fc   :  { %2846 = vmatmul.mubr.msk.f32.vlgmr.msra.gmra.mxu1 %vm1031_vm2, %v370_v61  ;;  %2868 = vmatprep.subr.mxu0 %v3063_v14 }
 0x1fd   :  { %2861 = vmatmul.mubr.msk.f32.vlgmr.msra.gmra.mxu0 %vm1031_vm2, %v437_v62  ;;  %2854 = vmatpush3.xpose.msk.msra.mxu1 %vm1031_vm2, %v732_v63 }
 0x1fe   :  { %2855 = vmatprep.mubr.msk.f32.mxu1 %vm3065_vm1, %v3063_v14  ;;  %2863 = vmatprep.subr.mxu1 %v3063_v14 }
 0x1ff   :  { %2870 = vmatprep.mubr.msk.f32.mxu0 %vm3065_vm1, %v3063_v14 }
 0x200   :  { %2856 = vmatmul.mubr.msk.f32.vlgmr.msra.gmra.mxu1 %vm1031_vm2, %v436_v0 }
 0x201   :  { %2864 = vmatpush3.xpose.msk.msra.mxu1 %vm1031_vm2, %v734_v1  ;;  %2865 = vmatprep.mubr.msk.f32.mxu1 %vm3065_vm1, %v3063_v14 }
 0x202   :  { %2873 = vmatprep.subr.mxu1 %v3063_v14 }
 0x204   :  { %2866 = vmatmul.mubr.msk.f32.vlgmr.msra.gmra.mxu1 %vm1031_vm2, %v438_v2 }
 0x205   :  { %2875 = vmatprep.mubr.msk.f32.mxu1 %vm3065_vm1, %v3063_v14 }
 0x2b0   :  { %v1104_v3 = vpop.f32.mrf.mxu1 }
 0x2b1   :  { %v1640_v4 = vsel %vm1031_vm2, %v1104_v3, -inf }
 0x2b2   :  { %1641 = vmax.xlane.f32.xlu0 %v1640_v4  ;;  %v2832_v7 = vpop.f32.mrf.mxu1 }
 0x2b4   :  { %v1180_v9 = vpop.f32.mrf.mxu1 }
 0x2b5   :  { %v1643_v37 = vsel %vm1031_vm2, %v1180_v9, -inf }
 0x2b6   :  { %v2837_v15 = vpop.f32.mrf.mxu1 }
 0x2b8   :  { %v1256_v16 = vpop.f32.mrf.mxu1 }
 0x2b9   :  { %v1408_v17 = vpop.f32.mrf.mxu0  ;;  %v1646_v18 = vsel %vm1031_vm2, %v1256_v16, -inf }
 0x2ba   :  { %1647 = vmax.xlane.f32.xlu0 %v1646_v18  ;;  %v2842_v22 = vpop.f32.mrf.mxu1  ;;  %v1652_v24 = vsel %vm1031_vm2, %v1408_v17, -inf }
 0x2bb   :  { %1653 = vmax.xlane.f32.xlu1 %v1652_v24  ;;  %v2852_v25 = vpop.f32.mrf.mxu0 }
 0x2bc   :  { %v1332_v26 = vpop.f32.mrf.mxu1 }
 0x2bd   :  { %v1560_v27 = vpop.f32.mrf.mxu0  ;;  %v1649_v28 = vsel %vm1031_vm2, %v1332_v26, -inf }
 0x2be   :  { %1650 = vmax.xlane.f32.xlu0 %v1649_v28  ;;  %v2847_v29 = vpop.f32.mrf.mxu1  ;;  %v1658_v30 = vsel %vm1031_vm2, %v1560_v27, -inf }
 0x2bf   :  { %1659 = vmax.xlane.f32.xlu1 %v1658_v30  ;;  %v2862_v31 = vpop.f32.mrf.mxu0 }
 0x2c0   :  { %v1484_v32 = vpop.f32.mrf.mxu1 }
 0x2c1   :  { %v1655_v33 = vsel %vm1031_vm2, %v1484_v32, -inf }
 0x2c2   :  { %1656 = vmax.xlane.f32.xlu0 %v1655_v33  ;;  %v2857_v36 = vpop.f32.mrf.mxu1 }
 0x2c3   :  { %1644 = vmax.xlane.f32.xlu1 %v1643_v37 }
 0x2c4   :  { %v1636_v38 = vpop.f32.mrf.mxu1 }
 0x2c5   :  { %v1661_v39 = vsel %vm1031_vm2, %v1636_v38, -inf }
 0x2c6   :  { %1662 = vmax.xlane.f32.xlu0 %v1661_v39  ;;  %v2867_v5 = vpop.f32.mrf.mxu1 }
 0x2d4   :  { %743 = vrot.lane.b32.xlu1 %v3123_v10, %s3064_s7 }
 0x2d8   :  { %747 = vrot.lane.b32.xlu1 %v3121_v8, %s3064_s7 }
 0x2dc   :  { %741 = vrot.lane.b32.xlu1 %v3127_v11, %s3064_s7  ;;  %737 = vrot.lane.b32.xlu0 %v3116_v6, %s3064_s7 }
 0x33b   :  { %v1642_v20 = vpop.xlane.xlu0 %1641 }
 0x33c   :  { %v1664_v40 = vsub.f32 %v1104_v3, %v1642_v20 }
 0x33e   :  { %v1672_v44 = vmul.f32 1.442695, %v1664_v40 }
 0x343   :  { %v1648_v41 = vpop.xlane.xlu0 %1647 }
 0x344   :  { %v1654_v42 = vpop.xlane.xlu1 %1653  ;;  %v1666_v45 = vsub.f32 %v1256_v16, %v1648_v41 }
 0x345   :  { %v1668_v43 = vsub.f32 %v1408_v17, %v1654_v42 }
 0x346   :  { %v1676_v48 = vmul.f32 1.442695, %v1666_v45 }
 0x347   :  { %v1680_v46 = vmul.f32 1.442695, %v1668_v43  ;;  %v1651_v10 = vpop.xlane.xlu0 %1650 }
 0x348   :  { %v1660_v47 = vpop.xlane.xlu1 %1659  ;;  %v1667_v49 = vsub.f32 %v1332_v26, %v1651_v10 }
 0x349   :  { %2936 = vpow2.f32 %v1680_v46  ;;  %v1670_v8 = vsub.f32 %v1560_v27, %v1660_v47 }
 0x34a   :  { %2938 = vpow2.f32 %v1672_v44  ;;  %v1678_v52 = vmul.f32 1.442695, %v1667_v49 }
 0x34b   :  { %v1684_v11 = vmul.f32 1.442695, %v1670_v8  ;;  %v1657_v50 = vpop.xlane.xlu0 %1656 }
 0x34c   :  { %v1645_v6 = vpop.xlane.xlu1 %1644  ;;  %v1669_v55 = vsub.f32 %v1484_v32, %v1657_v50 }
 0x34d   :  { %2940 = vpow2.f32 %v1684_v11  ;;  %v1665_v51 = vsub.f32 %v1180_v9, %v1645_v6 }
 0x34e   :  { %2942 = vpow2.f32 %v1676_v48  ;;  %v1682_v60 = vmul.f32 1.442695, %v1669_v55 }
 0x34f   :  { %v1674_v53 = vmul.f32 1.442695, %v1665_v51  ;;  %v1663_v54 = vpop.xlane.xlu0 %1662 }
 0x350   :  { %v744_v35 = vpop.permute.xlu1 %743  ;;  %v1671_v56 = vsub.f32 %v1636_v38, %v1663_v54 }
 0x351   :  { %2944 = vpow2.f32 %v1674_v53  ;;  %v759_v57 = vcombine.low %v736_v21, %v744_v35  ;;  %v760_v59 = vcombine.high %v736_v21, %v744_v35 }
 0x352   :  { %v1686_v58 = vmul.f32 1.442695, %v1671_v56  ;;  %2946 = vpow2.f32 %v1678_v52 }
 0x353   :  { %v767_v1 = vrot.slane %v759_v57, %v3146_v23  ;;  %v774_v3 = vrot.slane %v760_v59, %v3146_v23  ;;  %v738_v35 = vpop.permute.xlu0 %737 }
 0x354   :  { %2948 = vpow2.f32 %v1686_v58  ;;  %v748_v61 = vpop.permute.xlu1 %747 }
 0x355   :  { %v775_v62 = vcombine.low %v740_v19, %v748_v61  ;;  %v776_v63 = vcombine.high %v740_v19, %v748_v61  ;;  %2950 = vpow2.f32 %v1682_v60 }
 0x356   :  { %v3313_v0 = vpop.eup %2936 }
 0x357   :  { %v3316_v2 = vpop.eup %2938  ;;  %v783_v4 = vrot.slane %v775_v62, %v3146_v23  ;;  %v790_v7 = vrot.slane %v776_v63, %v3146_v23  ;;  %v1700_v9 = vsel %vm1031_vm2, %v3313_v0, 0.0 }
 0x358   :  { %1701 = vadd.xlane.f32.xlu1 %v1700_v9  ;;  %v1688_v24 = vsel %vm1031_vm2, %v3316_v2, 0.0  ;;  %v742_v54 = vpop.permute.xlu1 %741 }
 0x359   :  { %v791_v15 = vcombine.low %v767_v1, %v783_v4  ;;  %v792_v16 = vcombine.high %v767_v1, %v783_v4  ;;  %v807_v17 = vcombine.low %v774_v3, %v790_v7  ;;  %v808_v18 = vcombine.high %v774_v3, %v790_v7 }
 0x35a   :  { %v3323_v22 = vpop.eup %2940 }
 0x35b   :  { %v3327_v25 = vpop.eup %2942  ;;  %v799_v26 = vrot.slane %v791_v15, %v3159_v34  ;;  %v806_v27 = vrot.slane %v792_v16, %v3159_v34  ;;  %v815_v28 = vrot.slane %v807_v17, %v3159_v34  ;;  %v822_v29 = vrot.slane %v808_v18, %v3159_v34 }
 0x35c   :  { %v1706_v30 = vsel %vm1031_vm2, %v3323_v22, 0.0  ;;  %1689 = vadd.xlane.f32.xlu1 %v1688_v24  ;;  %v1694_v38 = vsel %vm1031_vm2, %v3327_v25, 0.0 }
 0x35d   :  { %v895_v31 = vcombine.low %v799_v26, %v806_v27  ;;  %v2738_v32 = vcombine.high %v799_v26, %v806_v27  ;;  %v911_v33 = vcombine.low %v815_v28, %v822_v29  ;;  %v2739_v36 = vcombine.high %v815_v28, %v822_v29  ;;  %1707 = vadd.xlane.f32.xlu0 %v1706_v30 }
 0x35e   :  { %v3335_v37 = vpop.eup %2944 }
 0x35f   :  { %v902_v39 = vrot.slane %v895_v31, %v3146_v23  ;;  %v910_v5 = vrot.slane %v2738_v32, %v3146_v23  ;;  %v918_v19 = vrot.slane %v911_v33, %v3146_v23  ;;  %v926_v20 = vrot.slane %v2739_v36, %v3146_v23  ;;  %v3343_v21 = vpop.eup %2946 }
 0x360   :  { %v1691_v40 = vsel %vm1031_vm2, %v3335_v37, 0.0  ;;  %1695 = vadd.xlane.f32.xlu1 %v1694_v38  ;;  %v1697_v11 = vsel %vm1031_vm2, %v3343_v21, 0.0 }
 0x361   :  { %v3347_v41 = vpop.eup %2948  ;;  %1692 = vadd.xlane.f32.xlu0 %v1691_v40  ;;  %v927_v42 = vcombine.low %v902_v39, %v910_v5  ;;  %v943_v43 = vcombine.low %v918_v19, %v926_v20  ;;  %v928_v44 = vcombine.high %v902_v39, %v910_v5  ;;  %v944_v45 = vcombine.high %v918_v19, %v926_v20 }
 0x362   :  { %v1709_v46 = vsel %vm1031_vm2, %v3347_v41, 0.0  ;;  %v3359_v49 = vpop.eup %2950 }
 0x363   :  { %v935_v10 = vrot.slane %v927_v42, %v3159_v34  ;;  %v951_v47 = vrot.slane %v943_v43, %v3159_v34  ;;  %v3354_v8 = vrot.slane %v928_v44, %v3159_v34  ;;  %v958_v48 = vrot.slane %v944_v45, %v3159_v34 }
 0x364   :  { %1710 = vadd.xlane.f32.xlu1 %v1709_v46  ;;  %v1703_v53 = vsel %vm1031_vm2, %v3359_v49, 0.0 }
 0x365   :  { %1698 = vadd.xlane.f32.xlu0 %v1697_v11  ;;  %v959_v50 = vcombine.low %v935_v10, %v951_v47  ;;  %v960_v6 = vcombine.high %v935_v10, %v951_v47  ;;  %v961_v51 = vcombine.low %v3354_v8, %v958_v48  ;;  %v962_v52 = vcombine.high %v3354_v8, %v958_v48 }
 0x367   :  { %2869 = vmatpush3.msra.mxu0 %v959_v50  ;;  %2874 = vmatpush3.msra.mxu1 %v960_v6 }
 0x368   :  { %2878 = vmatprep.subr.mxu0 %v3063_v14  ;;  %2883 = vmatprep.subr.mxu1 %v3063_v14 }
 0x369   :  { %1704 = vadd.xlane.f32.xlu0 %v1703_v53 }
 0x375   :  { %749 = vrot.lane.b32.xlu1 %v3131_v12, %s3064_s7 }
 0x37f   :  { %745 = vrot.lane.b32.xlu0 %v3133_v13, %s3064_s7 }
 0x3e1   :  { %v1702_v55 = vpop.xlane.xlu1 %1701 }
 0x3e5   :  { %v1690_v56 = vpop.xlane.xlu1 %1689 }
 0x3e6   :  { %2952 = vrcp.f32 %v1690_v56  ;;  %v1708_v57 = vpop.xlane.xlu0 %1707 }
 0x3e9   :  { %v1696_v58 = vpop.xlane.xlu1 %1695 }
 0x3ea   :  { %2954 = vrcp.f32 %v1696_v58  ;;  %v1693_v59 = vpop.xlane.xlu0 %1692 }
 0x3eb   :  { %2956 = vrcp.f32 %v1693_v59 }
 0x3ed   :  { %v1711_v60 = vpop.xlane.xlu1 %1710 }
 0x3ee   :  { %v1699_v61 = vpop.xlane.xlu0 %1698 }
 0x3ef   :  { %2958 = vrcp.f32 %v1699_v61 }
 0x3f0   :  { %2960 = vrcp.f32 %v1702_v55 }
 0x3f1   :  { %v750_v62 = vpop.permute.xlu1 %749 }
 0x3f2   :  { %v1705_v63 = vpop.xlane.xlu0 %1704  ;;  %v843_v12 = vcombine.low %v742_v54, %v750_v62  ;;  %v844_v13 = vcombine.high %v742_v54, %v750_v62 }
 0x3f3   :  { %v2953_v1 = vpop.eup %2952  ;;  %2962 = vrcp.f32 %v1705_v63 }
 0x3f4   :  { %v1720_v3 = vmul.f32 %v2953_v1, %v3316_v2  ;;  %v851_v17 = vrot.slane %v843_v12, %v3146_v23  ;;  %v858_v2 = vrot.slane %v844_v13, %v3146_v23  ;;  %2964 = vrcp.f32 %v1708_v57 }
 0x3f5   :  { %2966 = vrcp.f32 %v1711_v60 }
 0x3f6   :  { %v746_v4 = vpop.permute.xlu0 %745  ;;  %2871 = vmatmul.mubr.msk.f32.vlgmr.msra.gmra.mxu0 %vm1031_vm2, %v1720_v3 }
 0x3f7   :  { %v2955_v7 = vpop.eup %2954  ;;  %v827_v9 = vcombine.low %v738_v35, %v746_v4  ;;  %v828_v15 = vcombine.high %v738_v35, %v746_v4  ;;  %2879 = vmatpush3.msra.mxu0 %v961_v51  ;;  %2880 = vmatprep.mubr.msk.f32.mxu0 %vm3065_vm1, %v3063_v14 }
 0x3f8   :  { %v2957_v16 = vpop.eup %2956  ;;  %v1722_v18 = vmul.f32 %v2955_v7, %v3327_v25  ;;  %2888 = vmatprep.subr.mxu0 %v3063_v14 }
 0x3f9   :  { %v835_v24 = vrot.slane %v827_v9, %v3146_v23  ;;  %v842_v26 = vrot.slane %v828_v15, %v3146_v23  ;;  %v1721_v27 = vmul.f32 %v2957_v16, %v3335_v37 }
 0x3fa   :  { %2881 = vmatmul.mubr.msk.f32.vlgmr.msra.gmra.mxu0 %vm1031_vm2, %v1722_v18 }
 0x3fb   :  { %v859_v28 = vcombine.low %v835_v24, %v851_v17  ;;  %v860_v29 = vcombine.high %v835_v24, %v851_v17  ;;  %v875_v30 = vcombine.low %v842_v26, %v858_v2  ;;  %v876_v31 = vcombine.high %v842_v26, %v858_v2  ;;  %2876 = vmatmul.mubr.msk.f32.vlgmr.msra.gmra.mxu1 %vm1031_vm2, %v1721_v27 }
 0x3fc   :  { %v2959_v25 = vpop.eup %2958  ;;  %2884 = vmatpush3.msra.mxu1 %v962_v52  ;;  %2885 = vmatprep.mubr.msk.f32.mxu1 %vm3065_vm1, %v3063_v14 }
 0x3fd   :  { %v867_v32 = vrot.slane %v859_v28, %v3159_v34  ;;  %v874_v33 = vrot.slane %v860_v29, %v3159_v34  ;;  %v883_v36 = vrot.slane %v875_v30, %v3159_v34  ;;  %v890_v37 = vrot.slane %v876_v31, %v3159_v34  ;;  %2893 = vmatprep.subr.mxu1 %v3063_v14  ;;  %v2961_v47 = vpop.eup %2960 }
 0x3fe   :  { %v1723_v38 = vmul.f32 %v2959_v25, %v3343_v21  ;;  %2890 = vmatprep.mubr.msk.f32.mxu0 %vm3065_vm1, %v3063_v14  ;;  %v1724_v54 = vmul.f32 %v2961_v47, %v3313_v0 }
 0x3ff   :  { %v963_v39 = vcombine.low %v867_v32, %v874_v33  ;;  %v2740_v5 = vcombine.high %v867_v32, %v874_v33  ;;  %v979_v19 = vcombine.low %v883_v36, %v890_v37  ;;  %v2741_v20 = vcombine.high %v883_v36, %v890_v37 }
 0x400   :  { %2886 = vmatmul.mubr.msk.f32.vlgmr.msra.gmra.mxu1 %vm1031_vm2, %v1723_v38  ;;  %v2963_v8 = vpop.eup %2962 }
 0x401   :  { %v970_v40 = vrot.slane %v963_v39, %v3146_v23  ;;  %v978_v42 = vrot.slane %v2740_v5, %v3146_v23  ;;  %v986_v43 = vrot.slane %v979_v19, %v3146_v23  ;;  %v994_v44 = vrot.slane %v2741_v20, %v3146_v23  ;;  %2895 = vmatprep.mubr.msk.f32.mxu1 %vm3065_vm1, %v3063_v14  ;;  %v2965_v51 = vpop.eup %2964 }
 0x402   :  { %v1725_v55 = vmul.f32 %v2963_v8, %v3359_v49  ;;  %v2967_v35 = vpop.eup %2966  ;;  %v1726_v58 = vmul.f32 %v2965_v51, %v3323_v22 }
 0x403   :  { %v995_v21 = vcombine.low %v970_v40, %v978_v42  ;;  %v1011_v45 = vcombine.low %v986_v43, %v994_v44  ;;  %v996_v46 = vcombine.high %v970_v40, %v978_v42  ;;  %v1012_v10 = vcombine.high %v986_v43, %v994_v44 }
 0x404   :  { %v1727_v0 = vmul.f32 %v2967_v35, %v3347_v41 }
 0x405   :  { %v1003_v48 = vrot.slane %v995_v21, %v3159_v34  ;;  %v1019_v11 = vrot.slane %v1011_v45, %v3159_v34  ;;  %v1010_v50 = vrot.slane %v996_v46, %v3159_v34  ;;  %v1026_v6 = vrot.slane %v1012_v10, %v3159_v34 }
 0x407   :  { %v1027_v52 = vcombine.low %v1003_v48, %v1019_v11  ;;  %v1028_v53 = vcombine.high %v1003_v48, %v1019_v11  ;;  %v1029_v56 = vcombine.low %v1010_v50, %v1026_v6  ;;  %v1030_v57 = vcombine.high %v1010_v50, %v1026_v6 }
 0x409   :  { %2889 = vmatpush3.msra.mxu0 %v1027_v52  ;;  %2894 = vmatpush3.msra.mxu1 %v1028_v53 }
 0x40a   :  { %2891 = vmatmul.mubr.msk.f32.vlgmr.msra.gmra.mxu0 %vm1031_vm2, %v1724_v54  ;;  %2896 = vmatmul.mubr.msk.f32.vlgmr.msra.gmra.mxu1 %vm1031_vm2, %v1725_v55 }
 0x40b   :  { %2898 = vmatprep.subr.mxu0 %v3063_v14  ;;  %2903 = vmatprep.subr.mxu1 %v3063_v14 }
 0x40c   :  { %2899 = vmatpush3.msra.mxu0 %v1029_v56  ;;  %2904 = vmatpush3.msra.mxu1 %v1030_v57 }
 0x40d   :  { %2900 = vmatprep.mubr.msk.f32.mxu0 %vm3065_vm1, %v3063_v14  ;;  %2905 = vmatprep.mubr.msk.f32.mxu1 %vm3065_vm1, %v3063_v14 }
 0x40e   :  { %2901 = vmatmul.mubr.msk.f32.vlgmr.msra.gmra.mxu0 %vm1031_vm2, %v1726_v58  ;;  %2906 = vmatmul.mubr.msk.f32.vlgmr.msra.gmra.mxu1 %vm1031_vm2, %v1727_v0 }
 0x4b6   :  { %v1797_v49 = vpop.f32.mrf.mxu0 }
 0x4b8   :  { %v2872_v59 = vpop.f32.mrf.mxu0 }
 0x4b9   :  { %v2618_v59 = vld [vmem:[#allocation7 + $0x10] sm:$0xff] }
 0x4ba   :  { %v1943_v60 = vpop.f32.mrf.mxu0 }
 0x4bb   :  { %v1870_v61 = vpop.f32.mrf.mxu1  ;;  %v2312_v1 = vcombine.low %v1797_v49, %v1943_v60  ;;  %v2313_v22 = vcombine.high %v1797_v49, %v1943_v60  ;;  %v2619_v49 = vld [vmem:[#allocation7 + $0x18] sm:$0xff] }
 0x4bc   :  { %v2882_v62 = vpop.f32.mrf.mxu0  ;;  %2908 = vmatprep.subr.mxu0 %v2619_v49 }
 0x4bd   :  { %v2877_v63 = vpop.f32.mrf.mxu1  ;;  %v2320_v4 = vrot.slane %v2312_v1, %v3146_v23  ;;  %v2327_v14 = vrot.slane %v2313_v22, %v3146_v23  ;;  %2909 = vmatpush3.msra.mxu0 %v2619_v49 }
 0x4be   :  { %2910 = vmatprep.subr.mxu0 %v2618_v59 }
 0x4bf   :  { %2911 = vmatpush3.msra.mxu0 %v2618_v59 }
 0x4c0   :  { %v2016_v12 = vpop.f32.mrf.mxu1 }
 0x4c1   :  { %v2328_v41 = vcombine.low %v1870_v61, %v2016_v12  ;;  %v2329_v3 = vcombine.high %v1870_v61, %v2016_v12 }
 0x4c2   :  { %v2887_v13 = vpop.f32.mrf.mxu1 }
 0x4c3   :  { %v2336_v7 = vrot.slane %v2328_v41, %v3146_v23  ;;  %v2343_v9 = vrot.slane %v2329_v3, %v3146_v23  ;;  %v2617_v13 = vld [vmem:[#allocation7 + $0x8] sm:$0xff] }
 0x4c4   :  { %2912 = vmatprep.subr.mxu0 %v2617_v13 }
 0x4c5   :  { %v2344_v15 = vcombine.low %v2320_v4, %v2336_v7  ;;  %v2345_v16 = vcombine.high %v2320_v4, %v2336_v7  ;;  %v2360_v17 = vcombine.low %v2327_v14, %v2343_v9  ;;  %v2361_v18 = vcombine.high %v2327_v14, %v2343_v9  ;;  %v2616_v4 = vld [vmem:[#allocation7] sm:$0xff]  ;;  %2913 = vmatpush3.msra.mxu0 %v2617_v13 }
 0x4c6   :  { %2914 = vmatprep.subr.mxu0 %v2616_v4 }
 0x4c7   :  { %v2352_v2 = vrot.slane %v2344_v15, %v3159_v34  ;;  %v2359_v24 = vrot.slane %v2345_v16, %v3159_v34  ;;  %v2368_v26 = vrot.slane %v2360_v17, %v3159_v34  ;;  %v2375_v27 = vrot.slane %v2361_v18, %v3159_v34  ;;  %2915 = vmatpush3.msra.mxu0 %v2616_v4 }
 0x4c9   :  { %v2448_v28 = vcombine.low %v2352_v2, %v2359_v24  ;;  %v2766_v29 = vcombine.high %v2352_v2, %v2359_v24  ;;  %v2464_v30 = vcombine.low %v2368_v26, %v2375_v27  ;;  %v2767_v31 = vcombine.high %v2368_v26, %v2375_v27 }
 0x4ca   :  { %v2089_v25 = vpop.f32.mrf.mxu0  ;;  %v2162_v32 = vpop.f32.mrf.mxu1 }
 0x4cb   :  { %v2455_v33 = vrot.slane %v2448_v28, %v3146_v23  ;;  %v2463_v36 = vrot.slane %v2766_v29, %v3146_v23  ;;  %v2471_v37 = vrot.slane %v2464_v30, %v3146_v23  ;;  %v2479_v38 = vrot.slane %v2767_v31, %v3146_v23 }
 0x4cc   :  { %v2892_v39 = vpop.f32.mrf.mxu0  ;;  %v2897_v5 = vpop.f32.mrf.mxu1 }
 0x4cd   :  { %v2480_v19 = vcombine.low %v2455_v33, %v2463_v36  ;;  %v2496_v20 = vcombine.low %v2471_v37, %v2479_v38  ;;  %v2481_v43 = vcombine.high %v2455_v33, %v2463_v36  ;;  %v2497_v44 = vcombine.high %v2471_v37, %v2479_v38 }
 0x4ce   :  { %v2235_v40 = vpop.f32.mrf.mxu0  ;;  %v2308_v42 = vpop.f32.mrf.mxu1 }
 0x4cf   :  { %v2380_v21 = vcombine.low %v2089_v25, %v2235_v40  ;;  %v2381_v45 = vcombine.high %v2089_v25, %v2235_v40  ;;  %v2396_v46 = vcombine.low %v2162_v32, %v2308_v42  ;;  %v2397_v10 = vcombine.high %v2162_v32, %v2308_v42 }
 0x4d0   :  { %v2902_v47 = vpop.f32.mrf.mxu0  ;;  %v2907_v8 = vpop.f32.mrf.mxu1  ;;  %v3432_v48 = vrot.slane %v2480_v19, %v3159_v34  ;;  %v3435_v11 = vrot.slane %v2496_v20, %v3159_v34  ;;  %v2495_v55 = vrot.slane %v2481_v43, %v3159_v34  ;;  %v2511_v35 = vrot.slane %v2497_v44, %v3159_v34  ;;  %v2770_v43 = vld [vmem:[%s3479_s3] ss:$0 sm:$0xff] }
 0x4d1   :  { %v2388_v50 = vrot.slane %v2380_v21, %v3146_v23  ;;  %v2395_v6 = vrot.slane %v2381_v45, %v3146_v23  ;;  %v2404_v51 = vrot.slane %v2396_v46, %v3146_v23  ;;  %v2411_v52 = vrot.slane %v2397_v10, %v3146_v23 }
 0x4d2   :  { %v2513_v53 = vcombine.high %v3432_v48, %v3435_v11  ;;  %v2512_v54 = vcombine.low %v3432_v48, %v3435_v11  ;;  %v2514_v1 = vcombine.low %v2495_v55, %v2511_v35  ;;  %v2515_v16 = vcombine.high %v2495_v55, %v2511_v35 }
 0x4d3   :  { %v2412_v56 = vcombine.low %v2388_v50, %v2404_v51  ;;  %v2413_v57 = vcombine.high %v2388_v50, %v2404_v51  ;;  %v2428_v58 = vcombine.low %v2395_v6, %v2411_v52  ;;  %v2429_v0 = vcombine.high %v2395_v6, %v2411_v52 }
 0x4d4   :  { %2586 = vrot.lane.b32.xlu0 %v2513_v53, %s3057_s21 }
 0x4d5   :  { %v2420_v60 = vrot.slane %v2412_v56, %v3159_v34  ;;  %v2427_v61 = vrot.slane %v2413_v57, %v3159_v34  ;;  %v2436_v62 = vrot.slane %v2428_v58, %v3159_v34  ;;  %v2443_v63 = vrot.slane %v2429_v0, %v3159_v34 }
 0x4d7   :  { %v2516_v22 = vcombine.low %v2420_v60, %v2427_v61  ;;  %v2768_v12 = vcombine.high %v2420_v60, %v2427_v61  ;;  %v2532_v41 = vcombine.low %v2436_v62, %v2443_v63  ;;  %v2769_v3 = vcombine.high %v2436_v62, %v2443_v63 }
 0x4d8   :  { %2594 = vrot.lane.b32.xlu0 %v2514_v1, %s3068_s8 }
 0x4d9   :  { %v2523_v14 = vrot.slane %v2516_v22, %v3146_v23  ;;  %v2531_v7 = vrot.slane %v2768_v12, %v3146_v23  ;;  %v2539_v9 = vrot.slane %v2532_v41, %v3146_v23  ;;  %v2547_v15 = vrot.slane %v2769_v3, %v3146_v23 }
 0x4db   :  { %v2548_v17 = vcombine.low %v2523_v14, %v2531_v7  ;;  %v2564_v18 = vcombine.low %v2539_v9, %v2547_v15  ;;  %v2549_v2 = vcombine.high %v2523_v14, %v2531_v7  ;;  %v2565_v24 = vcombine.high %v2539_v9, %v2547_v15 }
 0x4dc   :  { %2602 = vrot.lane.b32.xlu0 %v2515_v16, %s3069_s9 }
 0x4dd   :  { %v2556_v26 = vrot.slane %v2548_v17, %v3159_v34  ;;  %v2572_v27 = vrot.slane %v2564_v18, %v3159_v34  ;;  %v2563_v30 = vrot.slane %v2549_v2, %v3159_v34  ;;  %v2579_v23 = vrot.slane %v2565_v24, %v3159_v34 }
 0x4df   :  { %v2581_v28 = vcombine.high %v2556_v26, %v2572_v27  ;;  %v2580_v29 = vcombine.low %v2556_v26, %v2572_v27  ;;  %v2582_v31 = vcombine.low %v2563_v30, %v2579_v23  ;;  %v2583_v25 = vcombine.high %v2563_v30, %v2579_v23 }
 0x4e1   :  { %2588 = vrot.lane.b32.xlu1 %v2581_v28, %s3057_s21 }
 0x4e5   :  { %2596 = vrot.lane.b32.xlu1 %v2582_v31, %s3068_s8 }
 0x4e9   :  { %2604 = vrot.lane.b32.xlu1 %v2583_v25, %s3069_s9 }
 0x546   :  { %v2587_v32 = vpop.permute.xlu0 %2586 }
 0x547   :  { %v2608_v36 = vsel %vm1031_vm2, %v2512_v54, %v2587_v32 }
 0x54a   :  { %v2595_v33 = vpop.permute.xlu0 %2594 }
 0x54b   :  { %v2611_v37 = vsel %vm2610_vm3, %v2608_v36, %v2595_v33 }
 0x54e   :  { %v2603_v38 = vpop.permute.xlu0 %2602 }
 0x54f   :  { %v2614_v39 = vsel %vm2613_vm4, %v2611_v37, %v2603_v38 }
 0x550   :  { %2916 = vmatprep.mubr.msk.f32.mxu0 %vm65_vm0, %v2614_v39 }
 0x553   :  { %v2589_v5 = vpop.permute.xlu1 %2588 }
 0x554   :  { %v2609_v34 = vsel %vm1031_vm2, %v2580_v29, %v2589_v5 }
 0x557   :  { %v2597_v19 = vpop.permute.xlu1 %2596 }
 0x558   :  { %v2612_v20 = vsel %vm2610_vm3, %v2609_v34, %v2597_v19 }
 0x55b   :  { %v2605_v40 = vpop.permute.xlu1 %2604 }
 0x55c   :  { %v2615_v42 = vsel %vm2613_vm4, %v2612_v20, %v2605_v40 }
 0x55d   :  { %2917 = vmatmul.mubr.msk.f32.vlgmr.msra.gmra.mxu0 %vm65_vm0, %v2615_v42 }
 0x61d   :  { %v2918_v44 = vpop.f32.mrf.mxu0 }
 0x61e   :  { %v2705_v21 = vadd.f32 %v2918_v44, %v2770_v43 }
 0x61f   :  { %v2699_v45 = vpop.f32.mrf.mxu0 }
 0x620   :  { %2709 = vst.msk [vmem:[#allocation8 + $0x8] sm:$0xff] %vm65_vm0, %v2705_v21  ;;  %v2700_v46 = vadd.f32 %v2770_v43, %v2699_v45 }
 0x622   :  { %2708 = vst.msk [vmem:[#allocation8] sm:$0xff] %vm65_vm0, %v2700_v46 }
 0x623   :  { %3039 = shalt.err (!%p3036_p5)
}
 0x624   :  { %2721 = dma.vmem_to_hbm [thread:$0]  %s2716_s13, 256, %s3480_s4, [#allocation4], %s3056_s20, %s3056_s20, %s3057_s21  }
 0x625   :  { %3052 = dma.done.wait [#allocation4], 256  }
 0x626   :  { %3053 = vsyncadd [#allocation4], 4294967040 }
 0x627   :  { %2725 = vsyncpa [#allocation3], 1 }
 0x628   :  { %2726 = vsyncpa [#allocation6], 1 }
 0x629   :  { %2727 = vsyncpa [#allocation4], 1 }

</bundles_post_ra>
